<compile_context>
chip_gen: v5e
topology: v5e:2x2
jax: 0.10.0
libtpu: 0.0.40
codegen_flags: <defaults>
</compile_context>

<pallas_src>
import math

import jax
import jax.numpy as jnp
from jax.experimental import pallas as pl
from jax.experimental.pallas import tpu as pltpu

_BLOCK_BYTES = 2 * 1024 * 1024                    # ~2 MiB per grid block
_LANE_CHOICES = (8192, 4096, 2048, 1024, 512, 256, 128)
_FALLBACK_LANES = 1024                            # only used when padding


def _exposure_kernel(sb_ref, img_ref, out_ref):
    # sb_ref: SMEM f32[2] -> [exp(exposure_a[idx]), exposure_b[idx]]
    scale = sb_ref[0]
    offset = sb_ref[1]
    x = img_ref[...].astype(jnp.float32)          # keep math in f32
    y = x * scale + offset                        # one FMA per vreg on the VPU
    out_ref[...] = jnp.clip(y, 0.0, 1.0).astype(out_ref.dtype)


def _pick_lane_width(total):
    """Largest multiple-of-128 lane width that divides `total` (no-pad path)."""
    for lane in _LANE_CHOICES:
        if total % lane == 0:
            return lane, False
    return _FALLBACK_LANES, True                  # rare: needs tail padding


class ExposureModel:
    def __init__(self, num_camera=None):
        self.num_camera = num_camera
        # Module __init__ uses zeros; shapes (num_camera, 1), float32.
        self.exposure_a = jnp.zeros((num_camera, 1), dtype=jnp.float32)
        self.exposure_b = jnp.zeros((num_camera, 1), dtype=jnp.float32)

    def __call__(self, idx, image):
        if self.num_camera == 1:
            return image

        # Parameter gather + scalar exp stay in plain JAX (hoisted out of the
        # grid loop); the two scalars travel to the kernel via SMEM.
        a = self.exposure_a[idx].reshape(())
        b = self.exposure_b[idx].reshape(())
        sb = jnp.stack([jnp.exp(a), b]).astype(jnp.float32)    # f32[2]

        orig_shape = image.shape
        total = math.prod(orig_shape)

        # Lane-dense slab (R, L).  Prefer an L that divides the element count
        # exactly so the reshape is a free bitcast (no pad copy, no tail
        # slice copy); pad only as a last resort.
        L, needs_pad = _pick_lane_width(total)
        flat = image.reshape(-1)
        pad = (-total) % L if needs_pad else 0
        if pad:
            flat = jnp.pad(flat, (0, pad))
        R = (total + pad) // L
        img2d = flat.reshape(R, L)

        # Row tile sized to ~_BLOCK_BYTES per block (multiple of 8 rows when
        # R > TR so the (8,128) block constraint holds; TR == R otherwise).
        itemsize = jnp.dtype(image.dtype).itemsize
        rows_budget = max(8, (_BLOCK_BYTES // (L * itemsize)) // 8 * 8)
        TR = R if R <= rows_budget else rows_budget
        grid = (pl.cdiv(R, TR),)

        out2d = pl.pallas_call(
            _exposure_kernel,
            out_shape=jax.ShapeDtypeStruct((R, L), image.dtype),
            grid=grid,
            in_specs=[
                pl.BlockSpec(memory_space=pltpu.MemorySpace.SMEM),  # [scale, b]
                pl.BlockSpec((TR, L), lambda i: (i, 0)),            # image tile
            ],
            out_specs=pl.BlockSpec((TR, L), lambda i: (i, 0)),
            compiler_params=pltpu.CompilerParams(
                dimension_semantics=("parallel",)),
        )(sb, img2d)

        if pad:
            return out2d.reshape(-1)[:total].reshape(orig_shape)
        return out2d.reshape(orig_shape)


def _reference(exposure_a, exposure_b, idx, image):
    a = exposure_a[idx].reshape(())
    b = exposure_b[idx].reshape(())
    return jnp.clip(jnp.exp(a) * image + b, 0.0, 1.0)


if __name__ == "__main__":
    key = jax.random.PRNGKey(0)
    k_img, k_a, k_b, k_img2, k_img3 = jax.random.split(key, 5)

    num_camera = 4
    model = ExposureModel(num_camera=num_camera)
    # Deterministic non-trivial parameters (module init is zeros; overwrite so
    # the exp/scale/offset/clamp path is actually exercised).
    model.exposure_a = 0.2 * jax.random.normal(k_a, (num_camera, 1), dtype=jnp.float32)
    model.exposure_b = 0.1 * jax.random.normal(k_b, (num_camera, 1), dtype=jnp.float32)

    idx = 2  # scalar camera index, as in the PyTorch usage

    # 1) Small NCHW image, values outside [0,1] so the clamp matters
    #    (exercises the exact-divisor, single-block path).
    B, C, H, W = 2, 3, 16, 16
    image = jax.random.uniform(k_img, (B, C, H, W), dtype=jnp.float32,
                               minval=-0.5, maxval=1.5)
    out = jax.block_until_ready(model(idx, image))
    ref = _reference(model.exposure_a, model.exposure_b, idx, image)
    assert out.shape == image.shape and out.dtype == image.dtype
    assert jnp.allclose(out, ref, atol=1e-6, rtol=1e-6)

    # 2) Larger image to exercise the tiled multi-block (grid > 1) path.
    B2, C2, H2, W2 = 2, 3, 256, 512
    image2 = jax.random.uniform(k_img2, (B2, C2, H2, W2), dtype=jnp.float32,
                                minval=-0.5, maxval=1.5)
    out2 = jax.block_until_ready(model(idx, image2))
    ref2 = _reference(model.exposure_a, model.exposure_b, idx, image2)
    assert out2.shape == image2.shape
    assert jnp.allclose(out2, ref2, atol=1e-6, rtol=1e-6)

    # 3) bf16 input (halves HBM traffic); math in f32, cast at the store.
    image_bf16 = image.astype(jnp.bfloat16)
    out_bf16 = jax.block_until_ready(model(idx, image_bf16))
    ref_bf16 = _reference(model.exposure_a, model.exposure_b, idx,
                          image_bf16.astype(jnp.float32)).astype(jnp.bfloat16)
    assert out_bf16.dtype == jnp.bfloat16
    assert jnp.allclose(out_bf16.astype(jnp.float32),
                        ref_bf16.astype(jnp.float32), atol=1e-2)

    # 4) Awkward size not divisible by 128 -> exercises the pad fallback path.
    image3 = jax.random.uniform(k_img3, (1, 3, 7, 9), dtype=jnp.float32,
                                minval=-0.5, maxval=1.5)
    out3 = jax.block_until_ready(model(idx, image3))
    ref3 = _reference(model.exposure_a, model.exposure_b, idx, image3)
    assert out3.shape == image3.shape
    assert jnp.allclose(out3, ref3, atol=1e-6, rtol=1e-6)

    # 5) num_camera == 1 early-return path (module returns the image as-is).
    model1 = ExposureModel(num_camera=1)
    out1 = jax.block_until_ready(model1(0, image))
    assert jnp.array_equal(out1, image)

    # TODO(synk): if idx is ever a per-image vector (B,), switch to a
    # scalar-prefetch per-row gather instead of a single SMEM (scale, b) pair.
    print("KERNEL_OK")
</pallas_src>

<mosaic_0001>
module attributes {stable_mosaic.version = 11 : i64} {
  func.func @_exposure_kernel(%arg0: i32, %arg1: memref<2xf32, #tpu.memory_space<smem>>, %arg2: memref<3x512xf32, #tpu.memory_space<vmem>>, %arg3: memref<3x512xf32, #tpu.memory_space<vmem>>) attributes {dimension_semantics = [#tpu.dimension_semantics<parallel>], iteration_bounds = array<i64: 1>, scalar_prefetch = 0 : i64, scratch_operands = 0 : i64, tpu.core_type = #tpu.core_type<tc>, window_params = [{transform_indices = @transform_0, window_bounds = array<i64: 2>}, {transform_indices = @transform_1, window_bounds = array<i64: 3, 512>}, {transform_indices = @transform_2, window_bounds = array<i64: 3, 512>}]} {
    %c0 = arith.constant 0 : index
    %0 = memref.load %arg1[%c0] : memref<2xf32, #tpu.memory_space<smem>>
    %c1 = arith.constant 1 : index
    %1 = memref.load %arg1[%c1] : memref<2xf32, #tpu.memory_space<smem>>
    %c0_0 = arith.constant 0 : index
    %c0_1 = arith.constant 0 : index
    %2 = vector.load %arg2[%c0_0, %c0_1] : memref<3x512xf32, #tpu.memory_space<vmem>>, vector<3x512xf32>
    %3 = vector.broadcast %0 : f32 to vector<3x512xf32>
    %4 = arith.mulf %2, %3 : vector<3x512xf32>
    %5 = vector.broadcast %1 : f32 to vector<3x512xf32>
    %6 = arith.addf %4, %5 : vector<3x512xf32>
    %cst = arith.constant 0.000000e+00 : f32
    %cst_2 = arith.constant 1.000000e+00 : f32
    %7 = vector.broadcast %cst : f32 to vector<3x512xf32>
    %8 = arith.maximumf %7, %6 : vector<3x512xf32>
    %9 = vector.broadcast %cst_2 : f32 to vector<3x512xf32>
    %10 = arith.minimumf %9, %8 : vector<3x512xf32>
    %c0_3 = arith.constant 0 : index
    %c0_4 = arith.constant 0 : index
    %11 = vector.load %arg3[%c0_3, %c0_4] : memref<3x512xf32, #tpu.memory_space<vmem>>, vector<3x512xf32>
    tpu.vector_store %arg3[%c0_3, %c0_4], %10 {strides = array<i32>} : memref<3x512xf32, #tpu.memory_space<vmem>>, vector<3x512xf32>,
    return
  }
  func.func @transform_0(%arg0: i32) -> i32 {
    %c0_i32 = arith.constant 0 : i32
    %c0_i32_0 = arith.constant 0 : i32
    return %c0_i32 : i32
  }
  func.func @transform_1(%arg0: i32) -> (i32, i32) {
    %c0_i32 = arith.constant 0 : i32
    %c0_i32_0 = arith.constant 0 : i32
    return %arg0, %c0_i32 : i32, i32
  }
  func.func @transform_2(%arg0: i32) -> (i32, i32) {
    %c0_i32 = arith.constant 0 : i32
    %c0_i32_0 = arith.constant 0 : i32
    return %arg0, %c0_i32 : i32, i32
  }
}

</mosaic_0001>

<bundles_post_ra>
// kernel: tpu_custom_call.1
= control target key start
LH: loop header
LB: loop body
LE: loop exit
PB: predicated region body
PF: predicated region fallthrough
CT: control target
= control target key end

     0   :  { %7 = vsyncpa [#allocation5], 0  ;;  %s170_s0 = inlined_call_operand.hbm [shape: f32[2], index: 0, kind: input, shape index: {}]   ;;  %s171_s1 = inlined_call_operand.hbm [shape: f32[3,512], index: 1, kind: input, shape index: {}]   ;;  %s172_s2 = inlined_call_operand.hbm [shape: f32[3,512], index: 2, kind: output, shape index: {}]  }
   0x1   :  { %8 = vsyncpa [#allocation3], 0 }
   0x2   :  { %9 = vsyncpa [#allocation4], 0  ;;  %s15_s11 = sshll.u32 %s170_s0, 4  ;;  %s24_s14 = sshll.u32 %s171_s1, 4  ;;  %s16_s11 = int_to_ptr.hbm [resolvable:$true] %s15_s11  ;;  %s25_s14 = int_to_ptr.hbm [resolvable:$true] %s24_s14 }
   0x3   :  { %s143_s15 = smov [#allocation2]   ;;  %s144_s16 = smov [#allocation6]  }
   0x4   :  { %18 = dma.hbm_to_smem %s16_s11, 16, %s143_s15, [#allocation5]  }
   0x5   :  { %s26_s17 = sshll.u32 %s144_s16, 4  ;;  %s27_s17 = int_to_ptr.vmem [resolvable:$true] %s26_s17 }
   0x6   :  { %29 = dma.hbm_to_vmem [thread:$0]  %s25_s14, 256, %s27_s17, [#allocation3]  }
   0x7   :  { %137 = dma.done.wait [#allocation5], 16  }
   0x8   :  { %138 = vsyncadd [#allocation5], 4294967280 }
   0x9   :  { %139 = dma.done.wait [#allocation3], 256  }
   0xa   :  { %140 = vsyncadd [#allocation3], 4294967040 }
   0xb   :  { %38 = sfence }
   0xc   :  { %s39_s18 = sld [smem:[#allocation2]]  ;;  %v41_v0 = vld [vmem:[#allocation6] sm:$0x77]  ;;  %v42_v1 = vld [vmem:[#allocation6 + $0x8] sm:$0x77]  ;;  %s145_s0 = smov [#allocation7]  }
   0xd   :  { %s73_s19 = sld [smem:[#allocation2 + $0x1]]  ;;  %s60_s1 = sshll.u32 %s145_s0, 4  ;;  %s61_s1 = int_to_ptr.vmem [resolvable:$true] %s60_s1 }
   0xe   :  { %s62_s22 = sshll.u32 %s172_s2, 4  ;;  %s63_s22 = int_to_ptr.hbm [resolvable:$true] %s62_s22 }
  0x12   :  { %v43_v2 = vstv %s39_s18 }
  0x13   :  { %v44_v3 = vmul.f32 %v43_v2, %v41_v0  ;;  %v46_v4 = vstv %s73_s19  ;;  %v45_v5 = vmul.f32 %v43_v2, %v42_v1 }
  0x15   :  { %v47_v6 = vadd.f32 %v46_v4, %v44_v3  ;;  %v48_v7 = vadd.f32 %v46_v4, %v45_v5 }
  0x17   :  { %v49_v8 = vmax.f32 %v47_v6, 0.0  ;;  %v50_v9 = vmax.f32 %v48_v7, 0.0 }
  0x19   :  { %v51_v10 = vmin.f32 %v49_v8, 1.0  ;;  %v52_v11 = vmin.f32 %v50_v9, 1.0 }
  0x1b   :  { %53 = vst [vmem:[#allocation7] sm:$0x77] %v51_v10 }
  0x1c   :  { %54 = vst [vmem:[#allocation7 + $0x8] sm:$0x77] %v52_v11 }
  0x1d   :  { %65 = dma.vmem_to_hbm [thread:$0]  %s61_s1, 256, %s63_s22, [#allocation4]  }
  0x1e   :  { %141 = dma.done.wait [#allocation4], 256  }
  0x1f   :  { %142 = vsyncadd [#allocation4], 4294967040 }
  0x20   :  { %70 = vsyncpa [#allocation3], 1 }
  0x21   :  { %71 = vsyncpa [#allocation4], 1 }
  0x22   :  { %72 = vsyncpa [#allocation5], 1 }

</bundles_post_ra>
